<compile_context>
chip_gen: v5e
topology: v5e:2x2
jax: 0.10.0
libtpu: 0.0.40
codegen_flags: <defaults>
</compile_context>

<pallas_src>
import functools

import jax
import jax.numpy as jnp
from jax import lax
from jax.experimental import pallas as pl
from jax.experimental.pallas import tpu as pltpu


# ----------------------------------------------------------------------------
# pltpu.roll direction probe (run once): the deconv needs exact "next row/col"
# shifts, so rather than bake in one rotation-direction convention we verify it
# on an 8x128 tile and pick the roll amounts accordingly.
# ----------------------------------------------------------------------------
_ROLL_LIKE_JNP = None


def _roll_probe_kernel(x_ref, o_ref):
    o_ref[...] = pltpu.roll(x_ref[...], 1, axis=0)


def _roll_like_jnp():
    """True iff pltpu.roll(x, s, axis) == jnp.roll(x, s, axis)."""
    global _ROLL_LIKE_JNP
    if _ROLL_LIKE_JNP is None:
        x = jnp.broadcast_to(jnp.arange(8, dtype=jnp.float32)[:, None], (8, 128))
        y = pl.pallas_call(
            _roll_probe_kernel,
            out_shape=jax.ShapeDtypeStruct((8, 128), jnp.float32))(x)
        # jnp.roll(x, 1, 0)[0, 0] == x[-1, 0] == 7
        _ROLL_LIKE_JNP = bool(float(y[0, 0]) == 7.0)
    return _ROLL_LIKE_JNP


# ----------------------------------------------------------------------------
# Kernel
# ----------------------------------------------------------------------------
def decoder_block_kernel(x_ref, w1_ref, b1_ref, wce1t_ref, wce2_ref, wsp_ref,
                         wdec_ref, bd2_ref, w3_ref, b3_ref, o_ref,
                         *, H, W, b_tile, shifts):
    # x_ref: (TM, Cin) with TM = b_tile*H*W rows packing b_tile images.
    # o_ref: (TM, 4F) phase packed [ee, eo, oe, oo] along the lane axis.
    f32 = jnp.float32
    bf16 = jnp.bfloat16
    TM = x_ref.shape[0]
    HW = H * W
    C = w1_ref.shape[1]

    # ---- conv1 (1x1) + folded BN1 + ReLU : (TM, Cin) @ (Cin, C), f32 ----
    t = jnp.dot(x_ref[...], w1_ref[...], preferred_element_type=f32) + b1_ref[...]
    t = jnp.maximum(t, 0.0)                                            # (TM, C)

    # ---- SCSE: t * (1 + channel_se + spatial_se)  (VPU/XLU, per-image pool) ----
    t3 = t.reshape(b_tile, HW, C)
    pooled = jnp.mean(t3, axis=1)                                      # (b_tile, C)
    ce_h = jnp.maximum(
        jnp.sum(pooled[:, None, :] * wce1t_ref[...][None, :, :], axis=2), 0.0)
    ce = jax.nn.sigmoid(
        jnp.sum(ce_h[:, :, None] * wce2_ref[...][None, :, :], axis=1))  # (b_tile, C)
    sp = jax.nn.sigmoid(
        jnp.sum(t * wsp_ref[...], axis=1, keepdims=True))               # (TM, 1)
    u = (t3 * (1.0 + ce[:, None, :] + sp.reshape(b_tile, HW, 1))).reshape(TM, C)

    # ---- +1 row/col neighbours: sublane rolls + right/bottom edge masks ----
    rows = lax.broadcasted_iota(jnp.int32, (TM, 1), 0)
    in_img = rows % HW
    not_last_col = (in_img % W != W - 1).astype(f32)
    not_last_row = (in_img // W != H - 1).astype(f32)
    s01, s10, s11 = shifts
    u01 = pltpu.roll(u, s01, axis=0) * not_last_col                     # in[m,   n+1]
    u10 = pltpu.roll(u, s10, axis=0) * not_last_row                     # in[m+1, n  ]
    u11 = pltpu.roll(u, s11, axis=0) * (not_last_col * not_last_row)    # in[m+1, n+1]

    # ---- ConvTranspose2d(3, s=2, p=1, op=1), phase packed: one K=4C bf16 matmul ----
    lhs = jnp.concatenate([u, u01, u10, u11], axis=1).astype(bf16)      # (TM, 4C)
    d = jnp.dot(lhs, wdec_ref[...], preferred_element_type=f32) + bd2_ref[...]
    d = jnp.maximum(d, 0.0)                                             # BN2 + ReLU

    # ---- conv3 as one block-diagonal (4C, 4F) bf16 matmul + folded BN3 + ReLU ----
    z = jnp.dot(d.astype(bf16), w3_ref[...], preferred_element_type=f32) + b3_ref[...]
    o_ref[...] = jnp.maximum(z, 0.0)                                    # lane-dense store


# ----------------------------------------------------------------------------
# Wrapper
# ----------------------------------------------------------------------------
def decoder_block_pallas(x_nchw, p):
    B, Cin, H, W = x_nchw.shape
    C = p['w1'].shape[1]
    F = p['w3'].shape[1]
    HW = H * W
    f32, bf16 = jnp.float32, jnp.bfloat16

    # NCHW -> NHWC -> (B*HW, Cin); (H,W)->HW collapse hoisted out of the kernel.
    x2d = jnp.transpose(x_nchw, (0, 2, 3, 1)).reshape(B * HW, Cin).astype(f32)

    # --- trace-time constant folding: BN (eval) into conv weights/biases ---
    w1f = p['w1'] * p['s1'][None, :]                                    # (Cin, C)
    b1f = (p['b1'] * p['s1'] + p['sh1'])[None, :]                       # (1, C)

    wce1t = p['wce1'].T                                                 # (Cr, C)
    wce2 = p['wce2']                                                    # (Cr, C)
    wsp_row = p['wsp'].reshape(1, C)                                    # (1, C)

    # Deconv taps, BN2-folded, phase packed along the output axis [ee,eo,oe,oo] and
    # vstacked over the four shifted inputs [u, u(+1col), u(+1row), u(+1both)].
    wd_s = p['wd'] * p['s2'][None, None, None, :]
    zero = jnp.zeros((C, C), f32)
    wa = jnp.concatenate([wd_s[1, 1], wd_s[1, 2], wd_s[2, 1], wd_s[2, 2]], axis=1)
    wb = jnp.concatenate([zero,       wd_s[1, 0], zero,       wd_s[2, 0]], axis=1)
    wc = jnp.concatenate([zero,       zero,       wd_s[0, 1], wd_s[0, 2]], axis=1)
    wdd = jnp.concatenate([zero,      zero,       zero,       wd_s[0, 0]], axis=1)
    wdec = jnp.concatenate([wa, wb, wc, wdd], axis=0).astype(bf16)      # (4C, 4C)
    bd2 = jnp.tile(p['bd'] * p['s2'] + p['sh2'], 4)[None, :]            # (1, 4C)

    w3f = p['w3'] * p['s3'][None, :]
    w3_big = jax.scipy.linalg.block_diag(w3f, w3f, w3f, w3f).astype(bf16)  # (4C, 4F)
    b3f = jnp.tile(p['b3'] * p['s3'] + p['sh3'], 4)[None, :]            # (1, 4F)

    # --- pack batch rows into the matmul M dimension (target M ~ 256) ---
    b_tile = max(1, min(B, 256 // HW))
    while B % b_tile:
        b_tile -= 1
    TM = b_tile * HW
    grid = (B // b_tile,)

    # Roll amounts realizing out[i] = in[i + k] for k in {1, W, W+1}.
    if _roll_like_jnp():
        shifts = (TM - 1, TM - W, TM - (W + 1))
    else:
        shifts = (1, W, W + 1)

    inputs = [x2d, w1f, b1f, wce1t, wce2, wsp_row, wdec, bd2, w3_big, b3f]

    def const_spec(a):  # whole (small) array, same block every grid step
        nd = a.ndim
        return pl.BlockSpec(a.shape, lambda g, _nd=nd: (0,) * _nd)

    in_specs = [pl.BlockSpec((TM, Cin), lambda g: (g, 0))]
    in_specs += [const_spec(a) for a in inputs[1:]]

    flops = int(B * HW * (2 * Cin * C + 2 * (4 * C) * (4 * C)
                          + 2 * (4 * C) * (4 * F) + 8 * C))
    bytes_accessed = int(4 * (x2d.size + B * HW * 4 * F)
                         + 2 * (wdec.size + w3_big.size)
                         + 4 * (w1f.size + b1f.size + wce1t.size + wce2.size
                                + wsp_row.size + bd2.size + b3f.size))
    cost = pl.CostEstimate(flops=flops,
                           transcendentals=int(B * HW + B * C),
                           bytes_accessed=bytes_accessed)

    out = pl.pallas_call(
        functools.partial(decoder_block_kernel, H=H, W=W, b_tile=b_tile,
                          shifts=shifts),
        out_shape=jax.ShapeDtypeStruct((B * HW, 4 * F), f32),
        grid_spec=pltpu.PrefetchScalarGridSpec(
            num_scalar_prefetch=0,
            grid=grid,
            in_specs=in_specs,
            out_specs=pl.BlockSpec((TM, 4 * F), lambda g: (g, 0)),
        ),
        compiler_params=pltpu.CompilerParams(
            # On v7x use (pltpu.CORE_PARALLEL,) to shard grid steps across both TCs.
            dimension_semantics=("parallel",),
            vmem_limit_bytes=32 * 1024 * 1024),
        cost_estimate=cost,
    )(*inputs)

    # (B*HW, [r, s, F]) -> NCHW in a single XLA transpose.
    out = out.reshape(B, H, W, 2, 2, F)
    return jnp.transpose(out, (0, 5, 1, 3, 2, 4)).reshape(B, F, 2 * H, 2 * W)


# ----------------------------------------------------------------------------
# Pure-JAX reference (eval-mode BN) and parameter construction
# ----------------------------------------------------------------------------
def ref_forward(x_nchw, p):
    HI = lax.Precision.HIGHEST
    x = jnp.transpose(x_nchw, (0, 2, 3, 1)).astype(jnp.float32)
    t = jnp.einsum('bhwc,cd->bhwd', x, p['w1'], precision=HI) + p['b1']
    t = jnp.maximum(t * p['s1'] + p['sh1'], 0.0)
    pooled = jnp.mean(t, axis=(1, 2), keepdims=True)
    ce = jnp.maximum(jnp.einsum('bhwc,cd->bhwd', pooled, p['wce1'], precision=HI), 0.0)
    ce = jax.nn.sigmoid(jnp.einsum('bhwc,cd->bhwd', ce, p['wce2'], precision=HI))
    sp = jax.nn.sigmoid(jnp.einsum('bhwc,cd->bhwd', t, p['wsp'], precision=HI))
    t = t + t * ce + t * sp
    # ConvTranspose2d == lhs-dilated conv with spatially flipped kernel
    k = jnp.flip(p['wd'], axis=(0, 1))                      # (kh, kw, ci, co) HWIO
    y = lax.conv_general_dilated(
        t, k, window_strides=(1, 1), padding=[(1, 2), (1, 2)],
        lhs_dilation=(2, 2), rhs_dilation=(1, 1),
        dimension_numbers=('NHWC', 'HWIO', 'NHWC'), precision=HI) + p['bd']
    y = jnp.maximum(y * p['s2'] + p['sh2'], 0.0)
    y = jnp.einsum('bhwc,cd->bhwd', y, p['w3'], precision=HI) + p['b3']
    y = jnp.maximum(y * p['s3'] + p['sh3'], 0.0)
    return jnp.transpose(y, (0, 3, 1, 2))


def make_params(key, in_channels, n_filters):
    C = in_channels // 4
    Cr = max(1, C // 16)
    eps = 1e-5
    ks = jax.random.split(key, 12)

    def nrm(k, shape, scale=0.1):
        return scale * jax.random.normal(k, shape, jnp.float32)

    def bn_fold(k, ch):
        k1, k2, k3, k4 = jax.random.split(k, 4)
        gamma = 1.0 + 0.1 * jax.random.normal(k1, (ch,), jnp.float32)
        beta = 0.1 * jax.random.normal(k2, (ch,), jnp.float32)
        mean = 0.1 * jax.random.normal(k3, (ch,), jnp.float32)
        var = jax.random.uniform(k4, (ch,), jnp.float32, 0.5, 1.5)
        s = gamma / jnp.sqrt(var + eps)
        return s, beta - mean * s

    s1, sh1 = bn_fold(ks[0], C)
    s2, sh2 = bn_fold(ks[1], C)
    s3, sh3 = bn_fold(ks[2], n_filters)
    return {
        # conv1: torch (C, Cin, 1, 1) -> matmul weight (Cin, C)
        'w1': nrm(ks[3], (in_channels, C)), 'b1': nrm(ks[4], (C,)),
        's1': s1, 'sh1': sh1,
        # SCSE channel excitation (no bias) and spatial SE (no bias)
        'wce1': nrm(ks[5], (C, Cr)), 'wce2': nrm(ks[6], (Cr, C)),
        'wsp': nrm(ks[7], (C, 1)),
        # deconv2: torch weight (Cin=C, Cout=C, 3, 3) stored as (kh, kw, ci, co)
        'wd': nrm(ks[8], (3, 3, C, C)), 'bd': nrm(ks[9], (C,)),
        's2': s2, 'sh2': sh2,
        # conv3: torch (F, C, 1, 1) -> (C, F)
        'w3': nrm(ks[10], (C, n_filters)), 'b3': nrm(ks[11], (n_filters,)),
        's3': s3, 'sh3': sh3,
    }


def _run_case(key, B, Cin, H, W, n_filters):
    kp, kx = jax.random.split(key)
    params = make_params(kp, Cin, n_filters)
    x = jax.random.normal(kx, (B, Cin, H, W), jnp.float32)
    out = jax.block_until_ready(decoder_block_pallas(x, params))
    ref = ref_forward(x, params)
    err = float(jnp.max(jnp.abs(out - ref)))
    ok = (out.shape == (B, n_filters, 2 * H, 2 * W)) and (err < 5e-2)
    return ok, out.shape, err


if __name__ == "__main__":
    key = jax.random.PRNGKey(0)
    k1, k2 = jax.random.split(key)
    # case 1: batch packed into matmul M (b_tile=2) -> per-image SCSE pooling + masks
    ok1, shp1, err1 = _run_case(k1, B=2, Cin=128, H=8, W=8, n_filters=32)
    # case 2: multi-step grid (b_tile=1, grid=(2,)) at a larger spatial size
    ok2, shp2, err2 = _run_case(k2, B=2, Cin=128, H=16, W=16, n_filters=32)
    if ok1 and ok2:
        print("KERNEL_OK")
    else:
        print(f"MISMATCH case1 shape={shp1} err={err1} ok={ok1} | "
              f"case2 shape={shp2} err={err2} ok={ok2}")
</pallas_src>

<mosaic_0001>
module attributes {stable_mosaic.version = 11 : i64} {
  func.func @_roll_probe_kernel(%arg0: memref<8x128xf32, #tpu.memory_space<vmem>>, %arg1: memref<8x128xf32, #tpu.memory_space<vmem>>) attributes {dimension_semantics = [], scalar_prefetch = 0 : i64, scratch_operands = 0 : i64, tpu.core_type = #tpu.core_type<tc>} {
    %c0 = arith.constant 0 : index
    %c0_0 = arith.constant 0 : index
    %0 = vector.load %arg0[%c0, %c0_0] : memref<8x128xf32, #tpu.memory_space<vmem>>, vector<8x128xf32>
    %c1_i32 = arith.constant 1 : i32
    %1 = tpu.dynamic_rotate %0 by %c1_i32 dim 0 : vector<8x128xf32>, i32 -> vector<8x128xf32>
    %c0_1 = arith.constant 0 : index
    %c0_2 = arith.constant 0 : index
    %2 = vector.load %arg1[%c0_1, %c0_2] : memref<8x128xf32, #tpu.memory_space<vmem>>, vector<8x128xf32>
    tpu.vector_store %arg1[%c0_1, %c0_2], %1 {strides = array<i32>} : memref<8x128xf32, #tpu.memory_space<vmem>>, vector<8x128xf32>,
    return
  }
}

</mosaic_0001>

<bundles_post_ra>
// kernel: tpu_custom_call.1
= control target key start
LH: loop header
LB: loop body
LE: loop exit
PB: predicated region body
PF: predicated region fallthrough
CT: control target
= control target key end

     0   :  { %6 = vsyncpa [#allocation3], 0  ;;  %s115_s0 = inlined_call_operand.hbm [shape: f32[8,128], index: 0, kind: input, shape index: {}]   ;;  %s116_s1 = inlined_call_operand.hbm [shape: f32[8,128], index: 1, kind: output, shape index: {}]  }
   0x1   :  { %7 = vsyncpa [#allocation4], 0  ;;  %s13_s8 = sshll.u32 %s115_s0, 4  ;;  %s97_s9 = smov [#allocation2]   ;;  %s14_s8 = int_to_ptr.hbm [resolvable:$true] %s13_s8 }
   0x2   :  { %s15_s10 = sshll.u32 %s97_s9, 4  ;;  %s16_s10 = int_to_ptr.vmem [resolvable:$true] %s15_s10 }
   0x3   :  { %18 = dma.hbm_to_vmem [thread:$0]  %s14_s8, 128, %s16_s10, [#allocation3]  }
   0x4   :  { %93 = dma.done.wait [#allocation3], 128  }
   0x5   :  { %94 = vsyncadd [#allocation3], 4294967168  ;;  %s98_s11 = smov [#allocation5]   ;;  %s33_s15 = sshll.u32 %s116_s1, 4  ;;  %v23_v0 = vld [vmem:[#allocation2] sm:$0xff]  ;;  %s34_s15 = int_to_ptr.hbm [resolvable:$true] %s33_s15 }
   0x6   :  { %s31_s12 = sshll.u32 %s98_s11, 4  ;;  %v24_v1 = vrot.slane %v23_v0, 7  ;;  %s32_s12 = int_to_ptr.vmem [resolvable:$true] %s31_s12 }
   0x8   :  { %25 = vst [vmem:[#allocation5] sm:$0xff] %v24_v1 }
   0x9   :  { %36 = dma.vmem_to_hbm [thread:$0]  %s32_s12, 128, %s34_s15, [#allocation4]  }
   0xa   :  { %95 = dma.done.wait [#allocation4], 128  }
   0xb   :  { %96 = vsyncadd [#allocation4], 4294967168 }
   0xc   :  { %41 = vsyncpa [#allocation3], 1 }
   0xd   :  { %42 = vsyncpa [#allocation4], 1 }

</bundles_post_ra>
